<compile_context>
chip_gen: v7x
topology: tpu7x:2x2x1
jax: 0.10.0
libtpu: 0.0.40
codegen_flags: <defaults>
</compile_context>

<pallas_src>
import functools
import math

import jax
import jax.numpy as jnp
from jax.experimental import pallas as pl
from jax.experimental.pallas import tpu as pltpu


def _round_up(x, m):
    return ((x + m - 1) // m) * m


def _make_kernel(pool_components, out_dims):
    """Kernel body, closed over the static pooling spec and head output dims."""
    o1, o2, o3 = out_dims

    def kernel(x_ref, wp_ref, bp_ref, wh_ref, bh_ref, wc_ref, bc_ref,
               logits_ref, pred_ref):
        x = x_ref[...]                                    # (B, L, D) f32
        Bn, Ln, Dn = x.shape

        # ---- projector_layer: Linear(D -> E) applied per token ----
        proj = jnp.dot(x.reshape(Bn * Ln, Dn), wp_ref[...],
                       preferred_element_type=jnp.float32) + bp_ref[...]
        E = proj.shape[-1]
        proj = proj.reshape(Bn, Ln, E)

        # ---- _layer_pooling over the sequence axis (dim=1) ----
        inv_L = jnp.float32(1.0 / Ln)
        inv_Lm1 = jnp.float32(1.0 / (Ln - 1))
        mu = None
        if ("mean" in pool_components) or ("std" in pool_components):
            mu = jnp.sum(proj, axis=1) * inv_L            # (B, E)

        pools = []
        for comp in pool_components:
            if comp == "mean":
                pools.append(mu)
            elif comp == "std":
                # torch.std default: unbiased (ddof=1); reuse the shared mean.
                centered = proj - mu[:, None, :]
                var = jnp.sum(centered * centered, axis=1) * inv_Lm1
                pools.append(jnp.sqrt(var))
            elif comp == "max":
                pools.append(jnp.max(proj, axis=1))
            elif comp == "min":
                pools.append(jnp.min(proj, axis=1))
        shared = jnp.concatenate(pools, axis=1)           # (B, E * n_pool)
        # dropout_shared / dropout_task{1,2,3}: identity in eval mode.

        # ---- fused task heads: one hidden matmul + one block-diag classifier ----
        hidden = jnp.dot(shared, wh_ref[...],
                         preferred_element_type=jnp.float32) + bh_ref[...]
        logits = jnp.dot(hidden, wc_ref[...],
                         preferred_element_type=jnp.float32) + bc_ref[...]
        logits_ref[...] = logits                          # lane-dense (padded) store

        # ---- torch.max(logits, 1) indices: first index achieving the max ----
        def argmax_first(sl):
            idx = jax.lax.broadcasted_iota(jnp.int32, sl.shape, 1)
            mx = jnp.max(sl, axis=1, keepdims=True)
            big = jnp.int32(2 ** 30)
            return jnp.min(jnp.where(sl == mx, idx, big), axis=1, keepdims=True)

        p1 = argmax_first(logits[:, :o1])
        p2 = argmax_first(logits[:, o1:o1 + o2])
        p3 = argmax_first(logits[:, o1 + o2:o1 + o2 + o3])
        pred_ref[...] = jnp.concatenate([p1, p2, p3], axis=1)   # (B, 3) int32

    return kernel


def init_params(key, input_dim, output_dim_array, embedding_dim_shared,
                embedding_dim_array, n_pool):
    """Deterministic synthetic parameter init (PyTorch nn.Linear layout)."""
    def linear(key, fan_in, fan_out):
        kw, kb = jax.random.split(key)
        bound = 1.0 / math.sqrt(fan_in)
        w = jax.random.uniform(kw, (fan_out, fan_in), jnp.float32, -bound, bound)
        b = jax.random.uniform(kb, (fan_out,), jnp.float32, -bound, bound)
        return w, b

    keys = jax.random.split(key, 7)
    shared_in = embedding_dim_shared * n_pool
    return {
        "projector": linear(keys[0], input_dim, embedding_dim_shared),
        "hidden1": linear(keys[1], shared_in, embedding_dim_array[0]),
        "hidden2": linear(keys[2], shared_in, embedding_dim_array[1]),
        "hidden3": linear(keys[3], shared_in, embedding_dim_array[2]),
        "cls1": linear(keys[4], embedding_dim_array[0], output_dim_array[0]),
        "cls2": linear(keys[5], embedding_dim_array[1], output_dim_array[1]),
        "cls3": linear(keys[6], embedding_dim_array[2], output_dim_array[2]),
    }


def prepare_params(params):
    """One-time transpose + fusion + lane-padding of PyTorch-layout params.

    Returns kernel-ready operands:
      wp (D,E), bp (1,E)
      wh (shared_in, H1+H2+H3), bh (1, H1+H2+H3)
      wc block-diagonal, zero-padded to (H1+H2+H3, round_up(O1+O2+O3, 128))
      bc (1, round_up(O1+O2+O3, 128))
    and the static per-head output dims (o1, o2, o3).
    """
    wp, bp = params["projector"]
    wh1, bh1 = params["hidden1"]
    wh2, bh2 = params["hidden2"]
    wh3, bh3 = params["hidden3"]
    wc1, bc1 = params["cls1"]
    wc2, bc2 = params["cls2"]
    wc3, bc3 = params["cls3"]

    h1, h2, h3 = wh1.shape[0], wh2.shape[0], wh3.shape[0]
    o1, o2, o3 = wc1.shape[0], wc2.shape[0], wc3.shape[0]
    o_sum = o1 + o2 + o3
    o_pad = _round_up(o_sum, 128)          # lane-dense logits store; MXU pads anyway

    wh = jnp.concatenate([wh1.T, wh2.T, wh3.T], axis=1)          # (shared_in, H_sum)
    bh = jnp.concatenate([bh1, bh2, bh3]).reshape(1, -1)

    # Block-diagonal classifier weight: off-diagonal / padding blocks are exactly
    # zero, so there is no cross-task leakage and padded logits are exactly 0.
    wc = jnp.zeros((h1 + h2 + h3, o_pad), jnp.float32)
    wc = wc.at[:h1, :o1].set(wc1.T)
    wc = wc.at[h1:h1 + h2, o1:o1 + o2].set(wc2.T)
    wc = wc.at[h1 + h2:, o1 + o2:o_sum].set(wc3.T)
    bc = jnp.zeros((1, o_pad), jnp.float32)
    bc = bc.at[0, :o_sum].set(jnp.concatenate([bc1, bc2, bc3]))

    prepared = {
        "wp": jnp.transpose(wp), "bp": bp.reshape(1, -1),
        "wh": wh, "bh": bh,
        "wc": wc, "bc": bc,
    }
    return prepared, (int(o1), int(o2), int(o3))


@functools.partial(jax.jit, static_argnames=("layer_pooling_type", "out_dims"))
def downstream_triple_task_forward(input_seq, prepared, layer_pooling_type,
                                   out_dims):
    """Returns (logits_tuple, prediction_tuple) matching the PyTorch forward."""
    pool_components = tuple(layer_pooling_type.split("_"))
    for comp in pool_components:
        if comp not in ("mean", "std", "max", "min"):
            raise ValueError("Invalid layer pooling type: " + layer_pooling_type)

    B, L, D = input_seq.shape
    o1, o2, o3 = out_dims
    o_sum = o1 + o2 + o3
    E = prepared["wp"].shape[1]
    shared_in, h_sum = prepared["wh"].shape
    o_pad = prepared["wc"].shape[1]

    # Advisory cost estimate so XLA schedules this tiny custom call tightly.
    flops = (2 * B * L * D * E + 2 * B * shared_in * h_sum
             + 2 * B * h_sum * o_pad + 6 * B * L * E)
    transcendentals = B * E * sum(1 for c in pool_components if c == "std")
    bytes_accessed = 4 * (input_seq.size
                          + sum(int(v.size) for v in prepared.values())
                          + B * o_pad + B * 3)
    ce = pl.CostEstimate(flops=flops, transcendentals=transcendentals,
                         bytes_accessed=bytes_accessed)

    kernel = _make_kernel(pool_components, out_dims)

    in_specs = [pl.BlockSpec(memory_space=pltpu.MemorySpace.VMEM)
                for _ in range(7)]
    out_specs = (pl.BlockSpec(memory_space=pltpu.MemorySpace.VMEM),
                 pl.BlockSpec(memory_space=pltpu.MemorySpace.VMEM))

    logits_all, preds = pl.pallas_call(
        kernel,
        out_shape=(jax.ShapeDtypeStruct((B, o_pad), jnp.float32),
                   jax.ShapeDtypeStruct((B, 3), jnp.int32)),
        in_specs=in_specs,
        out_specs=out_specs,
        cost_estimate=ce,
    )(input_seq, prepared["wp"], prepared["bp"], prepared["wh"],
      prepared["bh"], prepared["wc"], prepared["bc"])

    logits = (logits_all[:, :o1],
              logits_all[:, o1:o1 + o2],
              logits_all[:, o1 + o2:o1 + o2 + o3])
    prediction = (preds[:, 0], preds[:, 1], preds[:, 2])
    return logits, prediction


if __name__ == "__main__":
    # Small shapes consistent with the module's forward.
    B, L = 2, 8
    input_dim = 32
    embedding_dim_shared = 16
    embedding_dim_array = (16, 24, 8)
    output_dim_array = (4, 3, 5)
    layer_pooling_type = "mean_std_max_min"   # exercises all four pooling ops
    n_pool = len(layer_pooling_type.split("_"))

    key = jax.random.PRNGKey(0)
    k_in, k_par = jax.random.split(key)
    input_seq = jax.random.normal(k_in, (B, L, input_dim), jnp.float32)
    params = init_params(k_par, input_dim, output_dim_array,
                         embedding_dim_shared, embedding_dim_array, n_pool)

    prepared, out_dims = prepare_params(params)

    logits, prediction = downstream_triple_task_forward(
        input_seq, prepared, layer_pooling_type, out_dims)
    jax.block_until_ready((logits, prediction))

    # ---- lightweight pure-JAX reference check (same math as the PyTorch module) ----
    def ref_forward(x):
        wp, bp = params["projector"]
        proj = jnp.einsum("bld,ed->ble", x, wp) + bp
        mu = jnp.mean(proj, axis=1)
        sd = jnp.std(proj, axis=1, ddof=1)
        mx = jnp.max(proj, axis=1)
        mn = jnp.min(proj, axis=1)
        shared = jnp.concatenate([mu, sd, mx, mn], axis=1)

        def lin(h, p):
            w, b = p
            return h @ w.T + b

        l1 = lin(lin(shared, params["hidden1"]), params["cls1"])
        l2 = lin(lin(shared, params["hidden2"]), params["cls2"])
        l3 = lin(lin(shared, params["hidden3"]), params["cls3"])
        return l1, l2, l3

    r1, r2, r3 = ref_forward(input_seq)
    assert jnp.allclose(logits[0], r1, rtol=1e-3, atol=1e-4)
    assert jnp.allclose(logits[1], r2, rtol=1e-3, atol=1e-4)
    assert jnp.allclose(logits[2], r3, rtol=1e-3, atol=1e-4)

    # Predictions must equal first-index argmax of the kernel's own logits
    # (torch.max(x, 1) tie-breaking) and have shape (B,).
    for i, (lg, pr) in enumerate(zip(logits, prediction)):
        assert lg.shape == (B, output_dim_array[i])
        assert pr.shape == (B,)
        assert jnp.array_equal(pr, jnp.argmax(lg, axis=1))

    print("KERNEL_OK")
</pallas_src>

<mosaic_0001>
module attributes {stable_mosaic.version = 11 : i64} {
  func.func @kernel(%arg0: memref<2x8x32xf32, #tpu.memory_space<vmem>>, %arg1: memref<32x16xf32, #tpu.memory_space<vmem>>, %arg2: memref<1x16xf32, #tpu.memory_space<vmem>>, %arg3: memref<64x48xf32, #tpu.memory_space<vmem>>, %arg4: memref<1x48xf32, #tpu.memory_space<vmem>>, %arg5: memref<48x128xf32, #tpu.memory_space<vmem>>, %arg6: memref<1x128xf32, #tpu.memory_space<vmem>>, %arg7: memref<2x128xf32, #tpu.memory_space<vmem>>, %arg8: memref<2x3xi32, #tpu.memory_space<vmem>>) attributes {dimension_semantics = [], scalar_prefetch = 0 : i64, scratch_operands = 0 : i64, tpu.core_type = #tpu.core_type<tc>} {
    %c0 = arith.constant 0 : index
    %c0_0 = arith.constant 0 : index
    %c0_1 = arith.constant 0 : index
    %0 = vector.load %arg0[%c0, %c0_0, %c0_1] : memref<2x8x32xf32, #tpu.memory_space<vmem>>, vector<2x8x32xf32>
    %1 = vector.shape_cast %0 : vector<2x8x32xf32> to vector<16x32xf32>
    %c0_2 = arith.constant 0 : index
    %c0_3 = arith.constant 0 : index
    %2 = vector.load %arg1[%c0_2, %c0_3] : memref<32x16xf32, #tpu.memory_space<vmem>>, vector<32x16xf32>
    %cst = arith.constant dense<0.000000e+00> : vector<16x16xf32>
    %3 = tpu.matmul %1, %2, %cst {dimension_numbers = #tpu.dot_dimension_numbers<[1], [0], [0], [1], [0, 0, 1, 1], [], []>} : vector<16x32xf32>, vector<32x16xf32>, vector<16x16xf32> -> vector<16x16xf32>
    %c0_4 = arith.constant 0 : index
    %c0_5 = arith.constant 0 : index
    %4 = vector.load %arg2[%c0_4, %c0_5] : memref<1x16xf32, #tpu.memory_space<vmem>>, vector<1x16xf32>
    %5 = vector.broadcast %4 : vector<1x16xf32> to vector<16x16xf32>
    %6 = arith.addf %3, %5 : vector<16x16xf32>
    %7 = vector.shape_cast %6 : vector<16x16xf32> to vector<2x8x16xf32>
    %cst_6 = arith.constant dense<0.000000e+00> : vector<2x16xf32>
    %8 = vector.multi_reduction <add>, %7, %cst_6 [1] : vector<2x8x16xf32> to vector<2x16xf32>
    %cst_7 = arith.constant 1.250000e-01 : f32
    %9 = vector.broadcast %cst_7 : f32 to vector<2x16xf32>
    %10 = arith.mulf %8, %9 : vector<2x16xf32>
    %11 = vector.shape_cast %10 : vector<2x16xf32> to vector<2x1x16xf32>
    %12 = vector.broadcast %11 : vector<2x1x16xf32> to vector<2x8x16xf32>
    %13 = arith.subf %7, %12 : vector<2x8x16xf32>
    %14 = arith.mulf %13, %13 : vector<2x8x16xf32>
    %cst_8 = arith.constant dense<0.000000e+00> : vector<2x16xf32>
    %15 = vector.multi_reduction <add>, %14, %cst_8 [1] : vector<2x8x16xf32> to vector<2x16xf32>
    %cst_9 = arith.constant 0.142857149 : f32
    %16 = vector.broadcast %cst_9 : f32 to vector<2x16xf32>
    %17 = arith.mulf %15, %16 : vector<2x16xf32>
    %18 = math.sqrt %17 : vector<2x16xf32>
    %cst_10 = arith.constant dense<0xFF800000> : vector<2x16xf32>
    %19 = vector.multi_reduction <maximumf>, %7, %cst_10 [1] : vector<2x8x16xf32> to vector<2x16xf32>
    %cst_11 = arith.constant dense<0x7F800000> : vector<2x16xf32>
    %20 = vector.multi_reduction <minimumf>, %7, %cst_11 [1] : vector<2x8x16xf32> to vector<2x16xf32>
    %21 = tpu.concatenate %10, %18, %19, %20 in 1 : vector<2x16xf32>, vector<2x16xf32>, vector<2x16xf32>, vector<2x16xf32> -> vector<2x64xf32>
    %c0_12 = arith.constant 0 : index
    %c0_13 = arith.constant 0 : index
    %22 = vector.load %arg3[%c0_12, %c0_13] : memref<64x48xf32, #tpu.memory_space<vmem>>, vector<64x48xf32>
    %cst_14 = arith.constant dense<0.000000e+00> : vector<2x48xf32>
    %23 = tpu.matmul %21, %22, %cst_14 {dimension_numbers = #tpu.dot_dimension_numbers<[1], [0], [0], [1], [0, 0, 1, 1], [], []>} : vector<2x64xf32>, vector<64x48xf32>, vector<2x48xf32> -> vector<2x48xf32>
    %c0_15 = arith.constant 0 : index
    %c0_16 = arith.constant 0 : index
    %24 = vector.load %arg4[%c0_15, %c0_16] : memref<1x48xf32, #tpu.memory_space<vmem>>, vector<1x48xf32>
    %25 = vector.broadcast %24 : vector<1x48xf32> to vector<2x48xf32>
    %26 = arith.addf %23, %25 : vector<2x48xf32>
    %c0_17 = arith.constant 0 : index
    %c0_18 = arith.constant 0 : index
    %27 = vector.load %arg5[%c0_17, %c0_18] : memref<48x128xf32, #tpu.memory_space<vmem>>, vector<48x128xf32>
    %cst_19 = arith.constant dense<0.000000e+00> : vector<2x128xf32>
    %28 = tpu.matmul %26, %27, %cst_19 {dimension_numbers = #tpu.dot_dimension_numbers<[1], [0], [0], [1], [0, 0, 1, 1], [], []>} : vector<2x48xf32>, vector<48x128xf32>, vector<2x128xf32> -> vector<2x128xf32>
    %c0_20 = arith.constant 0 : index
    %c0_21 = arith.constant 0 : index
    %29 = vector.load %arg6[%c0_20, %c0_21] : memref<1x128xf32, #tpu.memory_space<vmem>>, vector<1x128xf32>
    %30 = vector.broadcast %29 : vector<1x128xf32> to vector<2x128xf32>
    %31 = arith.addf %28, %30 : vector<2x128xf32>
    %c0_22 = arith.constant 0 : index
    %c0_23 = arith.constant 0 : index
    %32 = vector.load %arg7[%c0_22, %c0_23] : memref<2x128xf32, #tpu.memory_space<vmem>>, vector<2x128xf32>
    tpu.vector_store %arg7[%c0_22, %c0_23], %31 {strides = array<i32>} : memref<2x128xf32, #tpu.memory_space<vmem>>, vector<2x128xf32>,
    %33 = vector.extract_strided_slice %31 {offsets = [0, 0], sizes = [2, 4], strides = [1, 1]} : vector<2x128xf32> to vector<2x4xf32>
    %34 = tpu.iota {dimensions = array<i32: 1>} : vector<2x4xi32>
    %cst_24 = arith.constant dense<0xFF800000> : vector<2xf32>
    %35 = vector.multi_reduction <maximumf>, %33, %cst_24 [1] : vector<2x4xf32> to vector<2xf32>
    %36 = vector.shape_cast %35 : vector<2xf32> to vector<2x1xf32>
    %37 = vector.broadcast %36 : vector<2x1xf32> to vector<2x4xf32>
    %38 = arith.cmpf oeq, %33, %37 : vector<2x4xf32>
    %c1073741824_i32 = arith.constant 1073741824 : i32
    %39 = vector.broadcast %c1073741824_i32 : i32 to vector<2x4xi32>
    %40 = arith.select %38, %34, %39 : vector<2x4xi1>, vector<2x4xi32>
    %cst_25 = arith.constant dense<2147483647> : vector<2xi32>
    %41 = vector.multi_reduction <minsi>, %40, %cst_25 [1] : vector<2x4xi32> to vector<2xi32>
    %42 = vector.shape_cast %41 : vector<2xi32> to vector<2x1xi32>
    %43 = vector.extract_strided_slice %31 {offsets = [0, 4], sizes = [2, 3], strides = [1, 1]} : vector<2x128xf32> to vector<2x3xf32>
    %44 = tpu.iota {dimensions = array<i32: 1>} : vector<2x3xi32>
    %cst_26 = arith.constant dense<0xFF800000> : vector<2xf32>
    %45 = vector.multi_reduction <maximumf>, %43, %cst_26 [1] : vector<2x3xf32> to vector<2xf32>
    %46 = vector.shape_cast %45 : vector<2xf32> to vector<2x1xf32>
    %47 = vector.broadcast %46 : vector<2x1xf32> to vector<2x3xf32>
    %48 = arith.cmpf oeq, %43, %47 : vector<2x3xf32>
    %c1073741824_i32_27 = arith.constant 1073741824 : i32
    %49 = vector.broadcast %c1073741824_i32_27 : i32 to vector<2x3xi32>
    %50 = arith.select %48, %44, %49 : vector<2x3xi1>, vector<2x3xi32>
    %cst_28 = arith.constant dense<2147483647> : vector<2xi32>
    %51 = vector.multi_reduction <minsi>, %50, %cst_28 [1] : vector<2x3xi32> to vector<2xi32>
    %52 = vector.shape_cast %51 : vector<2xi32> to vector<2x1xi32>
    %53 = vector.extract_strided_slice %31 {offsets = [0, 7], sizes = [2, 5], strides = [1, 1]} : vector<2x128xf32> to vector<2x5xf32>
    %54 = tpu.iota {dimensions = array<i32: 1>} : vector<2x5xi32>
    %cst_29 = arith.constant dense<0xFF800000> : vector<2xf32>
    %55 = vector.multi_reduction <maximumf>, %53, %cst_29 [1] : vector<2x5xf32> to vector<2xf32>
    %56 = vector.shape_cast %55 : vector<2xf32> to vector<2x1xf32>
    %57 = vector.broadcast %56 : vector<2x1xf32> to vector<2x5xf32>
    %58 = arith.cmpf oeq, %53, %57 : vector<2x5xf32>
    %c1073741824_i32_30 = arith.constant 1073741824 : i32
    %59 = vector.broadcast %c1073741824_i32_30 : i32 to vector<2x5xi32>
    %60 = arith.select %58, %54, %59 : vector<2x5xi1>, vector<2x5xi32>
    %cst_31 = arith.constant dense<2147483647> : vector<2xi32>
    %61 = vector.multi_reduction <minsi>, %60, %cst_31 [1] : vector<2x5xi32> to vector<2xi32>
    %62 = vector.shape_cast %61 : vector<2xi32> to vector<2x1xi32>
    %63 = tpu.concatenate %42, %52, %62 in 1 : vector<2x1xi32>, vector<2x1xi32>, vector<2x1xi32> -> vector<2x3xi32>
    %c0_32 = arith.constant 0 : index
    %c0_33 = arith.constant 0 : index
    %64 = vector.load %arg8[%c0_32, %c0_33] : memref<2x3xi32, #tpu.memory_space<vmem>>, vector<2x3xi32>
    tpu.vector_store %arg8[%c0_32, %c0_33], %63 {strides = array<i32>} : memref<2x3xi32, #tpu.memory_space<vmem>>, vector<2x3xi32>,
    return
  }
}

</mosaic_0001>

<bundles_post_ra>
// kernel: downstream_triple_task_forward.1
= control target key start
LH: loop header
LB: loop body
LE: loop exit
PB: predicated region body
PF: predicated region fallthrough
CT: control target
= control target key end

     0   :  { %vm41_vm0 = vcmask 261120   ;;  %vm123_vm1 = vcmask 130048   ;;  %v603_v27 = vmov 0.0|0.0   ;;  %vm204_vm2 = vcmask 1041409   ;;  %s604_s28 = smov 48   ;;  %s607_s18 = smov 16   ;;  %s774_s1 = inlined_call_operand.vmem [shape: f32[32,16], index: 1, kind: input, shape index: {}]   ;;  %s775_s0 = inlined_call_operand.vmem [shape: f32[2,8,32], index: 0, kind: input, shape index: {}]   ;;  %s776_s2 = inlined_call_operand.vmem [shape: f32[1,16], index: 2, kind: input, shape index: {}]   ;;  %s777_s3 = inlined_call_operand.vmem [shape: f32[64,48], index: 3, kind: input, shape index: {}]   ;;  %s778_s5 = inlined_call_operand.vmem [shape: f32[48,128], index: 5, kind: input, shape index: {}]   ;;  %s779_s4 = inlined_call_operand.vmem [shape: f32[1,48], index: 4, kind: input, shape index: {}]   ;;  %s780_s6 = inlined_call_operand.vmem [shape: f32[1,128], index: 6, kind: input, shape index: {}]   ;;  %s781_s7 = inlined_call_operand.vmem [shape: f32[2,128], index: 7, kind: output, shape index: {0}]   ;;  %s782_s8 = inlined_call_operand.vmem [shape: s32[2,3], index: 8, kind: output, shape index: {1}]  }
   0x1   :  { %v30_v0 = vld [vmem:[%s774_s1] sm:$0xff]  ;;  %v31_v1 = vld [vmem:[%s774_s1 + $0x8] sm:$0xff]  ;;  %v32_v2 = vld [vmem:[%s774_s1 + $0x10] sm:$0xff]  ;;  %570 = vmatprep.subr.bf16.mxu1 %v603_v27  ;;  %vm605_vm3 = vmmov 0   ;;  %vm227_vm8 = vcmask 392192   ;;  %vm244_vm9 = vcmask 523264  }
   0x2   :  { %v562_v3 = vpack.c.bf16 %v31_v1, %v30_v0  ;;  %v33_v4 = vld [vmem:[%s774_s1 + $0x18] sm:$0xff]  ;;  %v28_v5 = vld [vmem:[%s775_s0] sm:$0xff]  ;;  %v29_v7 = vld [vmem:[%s775_s0 + $0x8] sm:$0xff]  ;;  %s608_s0 = smov 32   ;;  %vm428_vm10 = vcmask 50208   ;;  %vm407_vm11 = vcmask 25600  }
   0x3   :  { %v566_v6 = vpack.c.bf16 %v33_v4, %v32_v2  ;;  %525 = vmatprep.mubr.msk.f32.mxu0 %vm41_vm0, %v28_v5  ;;  %v488_v8 = vld [vmem:[%s776_s2] ss:$0 sm:$0xff]  ;;  %v230_v29 = vld [vmem:[%s777_s3 + $0x8] sm:$0xff]  ;;  %v231_v30 = vld [vmem:[%s777_s3 + $0x10] sm:$0xff]  ;;  %vm451_vm12 = vcmask 91192  }
   0x4   :  { %563 = vmatprep.subr.bf16.mxu0 %v562_v3  ;;  %v229_v28 = vld [vmem:[%s777_s3] sm:$0xff]  ;;  %v232_v34 = vld [vmem:[%s777_s3 + $0x18] sm:$0xff]  ;;  %v234_v47 = vld [vmem:[%s777_s3 + $0x28] sm:$0xff] }
   0x5   :  { %565 = vmatpush3.bf16.msra.mxu0 %v562_v3  ;;  %v571_v33 = vpack.c.bf16 %v230_v29, %v229_v28  ;;  %v574_v41 = vpack.c.bf16 %v232_v34, %v231_v30  ;;  %v233_v46 = vld [vmem:[%s777_s3 + $0x20] sm:$0xff]  ;;  %v236_v28 = vld [vmem:[%s777_s3 + $0x38] sm:$0xff]  ;;  %v606_v30 = vmov 0.0  }
   0x6   :  { %567 = vmatprep.subr.bf16.mxu0 %v566_v6  ;;  %v577_v56 = vpack.c.bf16 %v234_v47, %v233_v46  ;;  %544 = vmatprep.mubr.msk.f32.mxu1 %vm605_vm3, %v606_v30  ;;  %v318_v34 = vld [vmem:[%s778_s5] sm:$0xff] }
   0x7   :  { %572 = vmatpush3.bf16.msra.mxu1 %v571_v33 }
   0x8   :  { %573 = vmatprep.subr.bf16.mxu1 %v603_v27 }
   0x9   :  { %569 = vmatpush3.bf16.msra.mxu0 %v566_v6 }
   0xa   :  { %582 = vmatprep.subr.bf16.mxu0 %v603_v27 }
   0xb   :  { %575 = vmatpush3.bf16.msra.mxu1 %v574_v41 }
   0xc   :  { %526 = vmatmul.mubr.msk.f32.vlgmr.msra.gmra.mrb[0].mxu0 %vm41_vm0, %v29_v7  ;;  %576 = vmatprep.subr.bf16.mxu1 %v603_v27 }
   0xd   :  { %559 = vmatprep.mubr.msk.f32.mxu0 %vm605_vm3, %v606_v30  ;;  %vm474_vm3 = vcmask 7168  }
   0xf   :  { %578 = vmatpush3.bf16.msra.mxu1 %v577_v56  ;;  %v491_v56 = vld [vmem:[%s779_s4] ss:$0 sm:$0xff]  ;;  %s609_s4 = smov 4  }
  0x10   :  { %579 = vmatprep.subr.bf16.mxu1 %v603_v27 }
  0xdf   :  { %v527_v9 = vpop.f32.mrb[0].mxu0 }
  0xe0   :  { %v679_v10 = vadd.f32 %v527_v9, %v488_v8  ;;  %v114_v11 = vpop.f32.mrb[1].mxu0 }
  0xe1   :  { %v681_v12 = vadd.f32 %v488_v8, %v114_v11 }
  0xe2   :  { %v131_v13 = vsel %vm123_vm1, %v679_v10, 0.0  ;;  %v181_v14 = vsel %vm123_vm1, %v679_v10, -inf  ;;  %v195_v15 = vsel %vm123_vm1, %v679_v10, inf }
  0xe3   :  { %v132_v16 = vrot.slane %v131_v13, 4  ;;  %v182_v17 = vrot.slane %v181_v14, 4  ;;  %v196_v18 = vrot.slane %v195_v15, 4  ;;  %v124_v19 = vsel %vm123_vm1, %v681_v12, 0.0 }
  0xe4   :  { %v125_v20 = vrot.slane %v124_v19, 4  ;;  %v174_v21 = vsel %vm123_vm1, %v681_v12, -inf  ;;  %v188_v22 = vsel %vm123_vm1, %v681_v12, inf }
  0xe5   :  { %v133_v23 = vadd.f32 %v132_v16, %v131_v13  ;;  %v183_v24 = vmax.f32 %v181_v14, %v182_v17  ;;  %v175_v25 = vrot.slane %v174_v21, 4  ;;  %v189_v26 = vrot.slane %v188_v22, 4 }
  0xe6   :  { %v126_v31 = vadd.f32 %v125_v20, %v124_v19  ;;  %v197_v32 = vmin.f32 %v195_v15, %v196_v18 }
  0xe7   :  { %v134_v35 = vrot.slane %v133_v23, 2  ;;  %v176_v36 = vmax.f32 %v174_v21, %v175_v25  ;;  %v190_v37 = vmin.f32 %v188_v22, %v189_v26  ;;  %v184_v38 = vrot.slane %v183_v24, 2  ;;  %v235_v26 = vld [vmem:[%s777_s3 + $0x30] sm:$0xff] }
  0xe8   :  { %v127_v39 = vrot.slane %v126_v31, 2  ;;  %v198_v40 = vrot.slane %v197_v32, 2  ;;  %v580_v29 = vpack.c.bf16 %v236_v28, %v235_v26 }
  0xe9   :  { %v135_v42 = vadd.f32 %v134_v35, %v133_v23  ;;  %v191_v43 = vrot.slane %v190_v37, 2  ;;  %v177_v44 = vrot.slane %v176_v36, 2  ;;  %v185_v45 = vmax.f32 %v183_v24, %v184_v38  ;;  %v319_v35 = vld [vmem:[%s778_s5 + $0x8] sm:$0xff] }
  0xea   :  { %v128_v48 = vadd.f32 %v127_v39, %v126_v31  ;;  %v199_v49 = vmin.f32 %v197_v32, %v198_v40  ;;  %581 = vmatpush3.bf16.msra.mxu1 %v580_v29  ;;  %v583_v39 = vpack.c.bf16 %v319_v35, %v318_v34  ;;  %v321_v40 = vld [vmem:[%s778_s5 + $0x18] sm:$0xff] }
  0xeb   :  { %v136_v50 = vrot.slane %v135_v42, 1  ;;  %v192_v51 = vmin.f32 %v190_v37, %v191_v43  ;;  %v178_v52 = vmax.f32 %v176_v36, %v177_v44  ;;  %v186_v53 = vrot.slane %v185_v45, 1  ;;  %v320_v36 = vld [vmem:[%s778_s5 + $0x10] sm:$0xff] }
  0xec   :  { %v129_v54 = vrot.slane %v128_v48, 1  ;;  %v200_v55 = vrot.slane %v199_v49, 1  ;;  %584 = vmatpush3.bf16.msra.mxu0 %v583_v39 }
  0xed   :  { %v137_v57 = vadd.f32 %v136_v50, %v135_v42  ;;  %v193_v58 = vrot.slane %v192_v51, 1  ;;  %v179_v59 = vrot.slane %v178_v52, 1  ;;  %v187_v60 = vmax.f32 %v185_v45, %v186_v53  ;;  %585 = vmatprep.subr.bf16.mxu0 %v603_v27 }
  0xee   :  { %v130_v61 = vadd.f32 %v129_v54, %v128_v48  ;;  %v201_v62 = vmin.f32 %v199_v49, %v200_v55  ;;  %v586_v45 = vpack.c.bf16 %v321_v40, %v320_v36  ;;  %v322_v54 = vld [vmem:[%s778_s5 + $0x20] sm:$0xff] }
  0xef   :  { %v139_v63 = vmul.f32 0.125, %v137_v57  ;;  %v194_v0 = vmin.f32 %v192_v51, %v193_v58  ;;  %v180_v1 = vmax.f32 %v178_v52, %v179_v59 }
  0xf0   :  { %v138_v2 = vmul.f32 0.125, %v130_v61  ;;  %587 = vmatpush3.bf16.msra.mxu0 %v586_v45 }
  0xf1   :  { %v141_v3 = vsub.f32 %v679_v10, %v139_v63  ;;  %v221_v4 = vsel %vm204_vm2, %v201_v62, %v194_v0  ;;  %v215_v5 = vsel %vm204_vm2, %v187_v60, %v180_v1  ;;  %588 = vmatprep.subr.bf16.mxu0 %v603_v27  ;;  %v323_v27 = vld [vmem:[%s778_s5 + $0x28] sm:$0xff]  ;;  %v493_v60 = vld [vmem:[%s780_s6] ss:$0 sm:$0xff]  ;;  %s610_s6 = smov 7  }
  0xf2   :  { %v140_v6 = vsub.f32 %v681_v12, %v138_v2  ;;  %222 = vrot.lane.b32.xlu1 %v221_v4, %s604_s28  ;;  %v205_v7 = vsel %vm204_vm2, %v139_v63, %v138_v2  ;;  %v589_v55 = vpack.c.bf16 %v323_v27, %v322_v54 }
  0xf3   :  { %v143_v8 = vmul.f32 %v141_v3, %v141_v3  ;;  %v405_v3 = vlaneseq }
  0xf4   :  { %v142_v9 = vmul.f32 %v140_v6, %v140_v6  ;;  %590 = vmatpush3.bf16.msra.mxu0 %v589_v55 }
  0xf5   :  { %v151_v11 = vsel %vm123_vm1, %v143_v8, 0.0  ;;  %v406_v4 = vand.u32 127, %v405_v3 }
  0xf6   :  { %v152_v13 = vrot.slane %v151_v11, 4  ;;  %v144_v14 = vsel %vm123_vm1, %v142_v9, 0.0 }
  0xf7   :  { %v145_v10 = vrot.slane %v144_v14, 4 }
  0xf8   :  { %v153_v15 = vadd.f32 %v152_v13, %v151_v11 }
  0xf9   :  { %v146_v16 = vadd.f32 %v145_v10, %v144_v14 }
  0xfa   :  { %v154_v17 = vrot.slane %v153_v15, 2 }
  0xfb   :  { %v147_v18 = vrot.slane %v146_v16, 2 }
  0xfc   :  { %v155_v19 = vadd.f32 %v154_v17, %v153_v15 }
  0xfd   :  { %v148_v20 = vadd.f32 %v147_v18, %v146_v16 }
  0xfe   :  { %v156_v21 = vrot.slane %v155_v19, 1 }
  0xff   :  { %v149_v12 = vrot.slane %v148_v20, 1 }
 0x100   :  { %v157_v22 = vadd.f32 %v156_v21, %v155_v19 }
 0x101   :  { %v150_v23 = vadd.f32 %v149_v12, %v148_v20 }
 0x102   :  { %v159_v24 = vmul.f32 0.14285715, %v157_v22 }
 0x103   :  { %v158_v25 = vmul.f32 0.14285715, %v150_v23 }
 0x104   :  { %599 = vrsqrt.f32 %v159_v24  ;;  %vm169_vm4 = vcmp.eq.f32.partialorder %v159_v24, inf  ;;  %v172_v38 = vand.u32 2147483648, %v159_v24  ;;  %vm171_vm6 = vcmp.eq.f32.partialorder %v159_v24, 0.0 }
 0x105   :  { %601 = vrsqrt.f32 %v158_v25  ;;  %vm162_vm5 = vcmp.eq.f32.partialorder %v158_v25, inf  ;;  %v165_v41 = vand.u32 2147483648, %v158_v25  ;;  %vm164_vm7 = vcmp.eq.f32.partialorder %v158_v25, 0.0 }
 0x10e   :  { %v600_v31 = vpop.eup %599 }
 0x10f   :  { %v602_v32 = vpop.eup %601  ;;  %v168_v33 = vmul.f32 %v600_v31, %v159_v24 }
 0x110   :  { %v161_v37 = vmul.f32 %v602_v32, %v158_v25 }
 0x111   :  { %v170_v42 = vsel %vm169_vm4, %v159_v24, %v168_v33  ;;  %vm476_vm4 = vcmask 15360  }
 0x112   :  { %v163_v43 = vsel %vm162_vm5, %v158_v25, %v161_v37  ;;  %v173_v44 = vsel %vm171_vm6, %v172_v38, %v170_v42  ;;  %vm478_vm5 = vcmask 17408  }
 0x113   :  { %v166_v46 = vsel %vm164_vm7, %v165_v41, %v163_v43 }
 0x114   :  { %v209_v47 = vsel %vm204_vm2, %v173_v44, %v166_v46 }
 0x115   :  { %210 = vrot.lane.b32.xlu0 %v209_v47, %s607_s18 }
 0x119   :  { %216 = vrot.lane.b32.xlu0 %v215_v5, %s608_s0 }
 0x164   :  { %v223_v51 = vpop.permute.xlu1 %222 }
 0x187   :  { %v211_v48 = vpop.permute.xlu0 %210 }
 0x188   :  { %v225_v49 = vsel %vm123_vm1, %v205_v7, %v211_v48 }
 0x18b   :  { %v217_v50 = vpop.permute.xlu0 %216 }
 0x18c   :  { %v226_v52 = vsel %vm41_vm0, %v225_v49, %v217_v50 }
 0x18d   :  { %v228_v53 = vsel %vm227_vm8, %v226_v52, %v223_v51 }
 0x18e   :  { %545 = vmatmul.mubr.msk.f32.vlgmr.msra.gmra.mrb[0].mxu1 %vm244_vm9, %v228_v53 }
 0x261   :  { %v314_v57 = vpop.f32.mrb[0].mxu1 }
 0x262   :  { %v315_v58 = vadd.f32 %v491_v56, %v314_v57  ;;  %v546_v59 = vpop.f32.mrb[1].mxu1 }
 0x264   :  { %560 = vmatmul.mubr.msk.f32.vlgmr.msra.gmra.mrb[2].mxu0 %vm227_vm8, %v315_v58 }
 0x337   :  { %v400_v61 = vpop.f32.mrb[2].mxu0 }
 0x338   :  { %v401_v62 = vadd.f32 %v493_v60, %v400_v61  ;;  %v561_v63 = vpop.f32.mrb[3].mxu0 }
 0x33a   :  { %404 = vst [vmem:[%s781_s7] sm:$0x3] %v401_v62  ;;  %v429_v0 = vsel %vm428_vm10, %v401_v62, -inf  ;;  %v408_v1 = vsel %vm407_vm11, %v401_v62, -inf  ;;  %v452_v2 = vsel %vm451_vm12, %v401_v62, -inf }
 0x33b   :  { %430 = vmax.xlane.f32.xlu0 %v429_v0  ;;  %409 = vmax.xlane.f32.xlu1 %v408_v1 }
 0x33f   :  { %453 = vmax.xlane.f32.xlu0 %v452_v2 }
 0x34c   :  { %433 = vrot.lane.b32.xlu1 %v406_v4, %s609_s4 }
 0x355   :  { %456 = vrot.lane.b32.xlu0 %v406_v4, %s610_s6 }
 0x3c8   :  { %v431_v5 = vpop.xlane.xlu0 %430  ;;  %v410_v6 = vpop.xlane.xlu1 %409 }
 0x3c9   :  { %vm411_vm13 = vcmp.eq.f32.partialorder %v401_v62, %v410_v6  ;;  %vm432_vm14 = vcmp.eq.f32.partialorder %v401_v62, %v431_v5 }
 0x3ca   :  { %v412_v7 = vsel %vm411_vm13, %v406_v4, 1073741824 }
 0x3cb   :  { %v413_v8 = vsel %vm407_vm11, %v412_v7, 2147483647 }
 0x3cc   :  { %v454_v9 = vpop.xlane.xlu0 %453  ;;  %v434_v11 = vpop.permute.xlu1 %433  ;;  %v415_v13 = vshra.s32 %v413_v8, 16  ;;  %v414_v22 = vand.u32 65535, %v413_v8 }
 0x3cd   :  { %v435_v14 = vsel %vm432_vm14, %v434_v11, 1073741824  ;;  %vm455_vm15 = vcmp.eq.f32.partialorder %v401_v62, %v454_v9 }
 0x3ce   :  { %v436_v10 = vsel %vm428_vm10, %v435_v14, 2147483647  ;;  %v417_v15 = vcvt.s32.f32 %v415_v13  ;;  %v416_v25 = vcvt.s32.f32 %v414_v22 }
 0x3cf   :  { %v438_v16 = vshra.s32 %v436_v10, 16  ;;  %v437_v23 = vand.u32 65535, %v436_v10 }
 0x3d0   :  { %v457_v17 = vpop.permute.xlu0 %456  ;;  %418 = vmin.xlane.f32.xlu1 %v417_v15 }
 0x3d1   :  { %v458_v18 = vsel %vm455_vm15, %v457_v17, 1073741824  ;;  %v440_v19 = vcvt.s32.f32 %v438_v16  ;;  %v439_v30 = vcvt.s32.f32 %v437_v23 }
 0x3d2   :  { %v459_v20 = vsel %vm451_vm12, %v458_v18, 2147483647 }
 0x3d3   :  { %441 = vmin.xlane.f32.xlu0 %v440_v19  ;;  %v461_v21 = vshra.s32 %v459_v20, 16  ;;  %v460_v28 = vand.u32 65535, %v459_v20 }
 0x3d5   :  { %v463_v12 = vcvt.s32.f32 %v461_v21  ;;  %v462_v33 = vcvt.s32.f32 %v460_v28 }
 0x3d7   :  { %464 = vmin.xlane.f32.xlu1 %v463_v12 }
 0x45d   :  { %v419_v24 = vpop.xlane.xlu1 %418 }
 0x45e   :  { %vm420_vm0 = vcmp.eq.f32.partialorder %v417_v15, %v419_v24  ;;  %v425_v37 = vcvt.f32.s32 %v419_v24 }
 0x45f   :  { %v421_v26 = vsel %vm420_vm0, %v416_v25, inf }
 0x460   :  { %v442_v29 = vpop.xlane.xlu0 %441  ;;  %422 = vmin.xlane.f32.xlu0 %v421_v26  ;;  %v426_v43 = vshll.u32 %v425_v37, 16 }
 0x461   :  { %vm443_vm1 = vcmp.eq.f32.partialorder %v440_v19, %v442_v29  ;;  %v448_v35 = vcvt.f32.s32 %v442_v29 }
 0x462   :  { %v444_v31 = vsel %vm443_vm1, %v439_v30, inf }
 0x463   :  { %445 = vmin.xlane.f32.xlu1 %v444_v31  ;;  %v449_v41 = vshll.u32 %v448_v35, 16 }
 0x464   :  { %v465_v32 = vpop.xlane.xlu1 %464 }
 0x465   :  { %vm466_vm2 = vcmp.eq.f32.partialorder %v463_v12, %v465_v32  ;;  %v471_v39 = vcvt.f32.s32 %v465_v32 }
 0x466   :  { %v467_v34 = vsel %vm466_vm2, %v462_v33, inf }
 0x467   :  { %468 = vmin.xlane.f32.xlu0 %v467_v34  ;;  %v472_v46 = vshll.u32 %v471_v39, 16 }
 0x4ed   :  { %v423_v36 = vpop.xlane.xlu0 %422 }
 0x4ee   :  { %v424_v42 = vcvt.f32.s32 %v423_v36 }
 0x4f0   :  { %v446_v38 = vpop.xlane.xlu1 %445  ;;  %v427_v48 = vadd.s32 %v426_v43, %v424_v42 }
 0x4f1   :  { %v447_v40 = vcvt.f32.s32 %v446_v38 }
 0x4f3   :  { %v450_v44 = vadd.s32 %v449_v41, %v447_v40 }
 0x4f4   :  { %v469_v45 = vpop.xlane.xlu0 %468 }
 0x4f5   :  { %v470_v47 = vcvt.f32.s32 %v469_v45  ;;  %v475_v50 = vsel %vm474_vm3, %v427_v48, %v450_v44 }
 0x4f7   :  { %v473_v49 = vadd.s32 %v472_v46, %v470_v47 }
 0x4f9   :  { %v477_v51 = vsel %vm476_vm4, %v475_v50, %v473_v49 }
 0x4fa   :  { %479 = vst.msk [vmem:[%s782_s8] sm:$0x3] %vm478_vm5, %v477_v51 }

</bundles_post_ra>
